<compile_context>
chip_gen: v7x
topology: tpu7x:2x2x1
jax: 0.10.0
libtpu: 0.0.40
codegen_flags: <defaults>
</compile_context>

<pallas_src>
import functools

import jax
import jax.numpy as jnp
from jax.experimental import pallas as pl
from jax.experimental.pallas import tpu as pltpu


BN_EPS = 1e-5


# ---------------------------------------------------------------------------
# Pallas kernels
# ---------------------------------------------------------------------------
def _matmul_bias_act_kernel(x_ref, w_ref, b_ref, o_ref, *, apply_relu):
    """One row tile: [tm, K]bf16 @ [K, N]bf16 -> f32 acc + bias (+ ReLU)."""
    acc = jnp.dot(x_ref[...], w_ref[...], preferred_element_type=jnp.float32)
    acc = acc + b_ref[...]                     # (1, N) f32 bias broadcasts over rows
    if apply_relu:
        acc = jnp.maximum(acc, 0.0)
    o_ref[...] = acc.astype(o_ref.dtype)


def _fc_stack_kernel(x_ref, w1_ref, b1_ref, w2_ref, b2_ref, w3_ref, b3_ref, o_ref):
    """Fused fc1(+BN folded)+ReLU -> fc2 feature head -> linear classifier."""
    h = jnp.dot(x_ref[...], w1_ref[...], preferred_element_type=jnp.float32) + b1_ref[...]
    h = jnp.maximum(h, 0.0).astype(jnp.bfloat16)
    f = jnp.dot(h, w2_ref[...], preferred_element_type=jnp.float32) + b2_ref[...]
    f = f.astype(jnp.bfloat16)
    logits = jnp.dot(f, w3_ref[...], preferred_element_type=jnp.float32) + b3_ref[...]
    o_ref[...] = logits.astype(o_ref.dtype)


# ---------------------------------------------------------------------------
# Pallas wrappers
# ---------------------------------------------------------------------------
def _pick_tiling(M):
    """Largest row tile <=512 giving >=2 grid steps (megacore); else one block."""
    for t in (512, 256, 128, 64):
        if M % t == 0 and M // t >= 2:
            return t, M // t, M
    if M <= 512:
        return M, 1, M
    t = 512
    gm = -(-M // t)
    return t, gm, gm * t


def _clamp_vmem(nbytes):
    return int(min(max(nbytes, 8 << 20), 48 << 20))


def matmul_bias_act(x, w, b, apply_relu=False, out_dtype=None):
    """x: [M, K], w: [K, N] (bf16), b: [N] f32 -> [M, N] out_dtype."""
    M, K = x.shape
    Kw, N = w.shape
    assert K == Kw, (K, Kw)
    out_dtype = out_dtype or x.dtype
    out_isz = jnp.dtype(out_dtype).itemsize

    tm, gm, Mp = _pick_tiling(M)
    xp = x if Mp == M else jnp.pad(x, ((0, Mp - M), (0, 0)))

    flops = 2 * Mp * K * N
    bytes_acc = (Mp * K * x.dtype.itemsize + K * N * w.dtype.itemsize
                 + N * 4 + Mp * N * out_isz)
    vmem = (2 * tm * K * x.dtype.itemsize + K * N * w.dtype.itemsize
            + 2 * tm * N * out_isz + 2 * N * 4 + (2 << 20))

    out = pl.pallas_call(
        functools.partial(_matmul_bias_act_kernel, apply_relu=apply_relu),
        out_shape=jax.ShapeDtypeStruct((Mp, N), out_dtype),
        grid=(gm,),
        in_specs=[
            pl.BlockSpec((tm, K), lambda i: (i, 0)),   # row tile of activations
            pl.BlockSpec((K, N), lambda i: (0, 0)),    # full weight resident in VMEM
            pl.BlockSpec((1, N), lambda i: (0, 0)),    # bias row (f32)
        ],
        out_specs=pl.BlockSpec((tm, N), lambda i: (i, 0)),
        compiler_params=pltpu.CompilerParams(
            dimension_semantics=("parallel",),
            vmem_limit_bytes=_clamp_vmem(vmem)),
        cost_estimate=pl.CostEstimate(flops=int(flops), transcendentals=0,
                                      bytes_accessed=int(bytes_acc)),
    )(xp, w, b.reshape(1, N))
    return out if Mp == M else out[:M]


def fc_stack_pallas(h, w1, b1, w2, b2, w3, b3):
    """Fused fc1 -> fc2 -> classifier, batch-tiled. h: [B, K1] bf16 -> [B, N3] f32."""
    B, K1 = h.shape
    N1, N2, N3 = w1.shape[1], w2.shape[1], w3.shape[1]

    tb = B if B <= 256 else 256
    gb = -(-B // tb)
    Bp = gb * tb
    hp = h if Bp == B else jnp.pad(h, ((0, Bp - B), (0, 0)))

    w_bytes = (K1 * N1 + N1 * N2 + N2 * N3) * w1.dtype.itemsize
    flops = 2 * Bp * (K1 * N1 + N1 * N2 + N2 * N3)
    bytes_acc = Bp * K1 * h.dtype.itemsize + w_bytes + (N1 + N2 + N3) * 4 + Bp * N3 * 4
    vmem = 2 * tb * K1 * h.dtype.itemsize + w_bytes + 2 * tb * N3 * 4 + (2 << 20)

    out = pl.pallas_call(
        _fc_stack_kernel,
        out_shape=jax.ShapeDtypeStruct((Bp, N3), jnp.float32),
        grid=(gb,),
        in_specs=[
            pl.BlockSpec((tb, K1), lambda i: (i, 0)),
            pl.BlockSpec((K1, N1), lambda i: (0, 0)),
            pl.BlockSpec((1, N1), lambda i: (0, 0)),
            pl.BlockSpec((N1, N2), lambda i: (0, 0)),
            pl.BlockSpec((1, N2), lambda i: (0, 0)),
            pl.BlockSpec((N2, N3), lambda i: (0, 0)),
            pl.BlockSpec((1, N3), lambda i: (0, 0)),
        ],
        out_specs=pl.BlockSpec((tb, N3), lambda i: (i, 0)),
        compiler_params=pltpu.CompilerParams(
            dimension_semantics=("parallel",),
            vmem_limit_bytes=_clamp_vmem(vmem)),
        cost_estimate=pl.CostEstimate(flops=int(flops), transcendentals=0,
                                      bytes_accessed=int(bytes_acc)),
    )(hp, w1, b1.reshape(1, N1), w2, b2.reshape(1, N2), w3, b3.reshape(1, N3))
    return out if Bp == B else out[:B]


# ---------------------------------------------------------------------------
# Plain-JAX glue: NHWC im2col (pure data rearrangement; no transposes)
# ---------------------------------------------------------------------------
def im2col_nhwc(x, kh, kw, stride, pad):
    """x: [B, H, W, C] -> ([B*Ho*Wo, kh*kw*C], Ho, Wo). Feature order (kh, kw, C)."""
    B, H, W, C = x.shape
    xp = jnp.pad(x, ((0, 0), (pad, pad), (pad, pad), (0, 0)))
    Ho = (H + 2 * pad - kh) // stride + 1
    Wo = (W + 2 * pad - kw) // stride + 1
    cols = []
    for i in range(kh):
        for j in range(kw):
            cols.append(xp[:, i:i + stride * Ho:stride, j:j + stride * Wo:stride, :])
    col = jnp.stack(cols, axis=3)                       # [B, Ho, Wo, kh*kw, C]
    col = col.reshape(B * Ho * Wo, kh * kw * C)
    return col, Ho, Wo


def conv2d_pallas_nhwc(x, w2d, b, kh, kw, stride, pad, apply_relu):
    """NHWC conv via im2col + fused Pallas matmul. w2d: [kh*kw*Cin, Cout] bf16."""
    B = x.shape[0]
    col, Ho, Wo = im2col_nhwc(x, kh, kw, stride, pad)
    y = matmul_bias_act(col, w2d, b, apply_relu=apply_relu, out_dtype=jnp.bfloat16)
    return y.reshape(B, Ho, Wo, w2d.shape[1])           # stays channels-last


# ---------------------------------------------------------------------------
# Parameter setup (deterministic; eval-mode BatchNorm folded; bf16 weights)
# ---------------------------------------------------------------------------
def _fold_bn(w, b):
    """Fold eval-mode BatchNorm with default init (gamma=1, beta=0, mean=0, var=1).
    NOTE: real trained weights would need the actual running stats here."""
    scale = 1.0 / jnp.sqrt(1.0 + BN_EPS)
    return w * scale, b * scale


def _pack_conv(w_oihw):
    """[Cout, Cin, kh, kw] -> matmul weight [kh*kw*Cin, Cout] (no padding)."""
    cout, cin, kh, kw = w_oihw.shape
    w = jnp.transpose(w_oihw, (2, 3, 1, 0))             # [kh, kw, Cin, Cout]
    return w.reshape(kh * kw * cin, cout)


def init_params(key, in_ch=3, c1=16, c2=32, c3=64, fc_hidden=128, feat_dim=64,
                num_classes=10, spatial=16):
    ks = jax.random.split(key, 6)
    s_out = spatial // 8                                 # three stride-2 convs

    def nrm(k, shape, fan_in):
        return jax.random.normal(k, shape, jnp.float32) * (1.0 / jnp.sqrt(fan_in))

    p = {}
    # --- BasicEncoder convs (BN2d folded for conv2/conv3) ---
    w1 = nrm(ks[0], (c1, in_ch, 4, 4), in_ch * 16)
    p["conv1_w"] = _pack_conv(w1).astype(jnp.bfloat16)            # [48, 16]
    p["conv1_b"] = jnp.zeros((c1,), jnp.float32)

    w2 = nrm(ks[1], (c2, c1, 4, 4), c1 * 16)
    w2, b2 = _fold_bn(w2, jnp.zeros((c2,), jnp.float32))
    p["conv2_w"] = _pack_conv(w2).astype(jnp.bfloat16)            # [256, 32]
    p["conv2_b"] = b2

    w3 = nrm(ks[2], (c3, c2, 4, 4), c2 * 16)
    w3, b3 = _fold_bn(w3, jnp.zeros((c3,), jnp.float32))
    p["conv3_w"] = _pack_conv(w3).astype(jnp.bfloat16)            # [512, 64]
    p["conv3_b"] = b3

    # --- fc1 (+BN1d folded) over the NHWC flatten (h, w, c) of conv3 output ---
    wf1 = nrm(ks[3], (s_out, s_out, c3, fc_hidden), c3 * s_out * s_out)
    wf1, bf1 = _fold_bn(wf1, jnp.zeros((fc_hidden,), jnp.float32))
    p["fc1_w"] = wf1.reshape(s_out * s_out * c3, fc_hidden).astype(jnp.bfloat16)
    p["fc1_b"] = bf1

    # --- fc2 feature head ---
    p["fc2_w"] = nrm(ks[4], (fc_hidden, feat_dim), fc_hidden).astype(jnp.bfloat16)
    p["fc2_b"] = jnp.zeros((feat_dim,), jnp.float32)

    # --- LinearClassifier ---
    p["cls_w"] = nrm(ks[5], (feat_dim, num_classes), feat_dim).astype(jnp.bfloat16)
    p["cls_b"] = jnp.zeros((num_classes,), jnp.float32)
    return p


# ---------------------------------------------------------------------------
# Forward pass: BaselineH = BasicEncoder -> LinearClassifier
# ---------------------------------------------------------------------------
def baselineh_forward(params, x):
    B = x.shape[0]
    # Single layout/dtype change at the boundary: NCHW f32 -> NHWC bf16.
    h = jnp.transpose(x, (0, 2, 3, 1)).astype(jnp.bfloat16)
    # --- BasicEncoder: three stride-2 4x4 convs (+BN folded) + ReLU, all NHWC ---
    h = conv2d_pallas_nhwc(h, params["conv1_w"], params["conv1_b"], 4, 4, 2, 1, True)
    h = conv2d_pallas_nhwc(h, params["conv2_w"], params["conv2_b"], 4, 4, 2, 1, True)
    h = conv2d_pallas_nhwc(h, params["conv3_w"], params["conv3_b"], 4, 4, 2, 1, True)
    h = h.reshape(B, -1)                                 # NHWC flatten [B, s*s*c3]
    # --- fused fc1+ReLU -> fc2 feature head -> LinearClassifier (one kernel) ---
    logits = fc_stack_pallas(h, params["fc1_w"], params["fc1_b"],
                             params["fc2_w"], params["fc2_b"],
                             params["cls_w"], params["cls_b"])
    return logits


if __name__ == "__main__":
    key = jax.random.PRNGKey(0)
    k_param, k_x = jax.random.split(key)
    params = init_params(k_param, spatial=16)
    x = jax.random.normal(k_x, (2, 3, 16, 16), jnp.float32)   # small CIFAR-like NCHW

    fwd = jax.jit(baselineh_forward)
    out = jax.block_until_ready(fwd(params, x))

    assert out.shape == (2, 10), out.shape
    assert out.dtype == jnp.float32
    assert bool(jnp.all(jnp.isfinite(out)))
    print("KERNEL_OK")
</pallas_src>

<mosaic_0001>
module attributes {stable_mosaic.version = 11 : i64} {
  func.func @_matmul_bias_act_kernel(%arg0: i32, %arg1: memref<64x48xbf16, #tpu.memory_space<vmem>>, %arg2: memref<48x16xbf16, #tpu.memory_space<vmem>>, %arg3: memref<1x16xf32, #tpu.memory_space<vmem>>, %arg4: memref<64x16xbf16, #tpu.memory_space<vmem>>) attributes {dimension_semantics = [#tpu.dimension_semantics<parallel>], iteration_bounds = array<i64: 2>, scalar_prefetch = 0 : i64, scratch_operands = 0 : i64, tpu.core_type = #tpu.core_type<tc>, window_params = [{transform_indices = @transform_0, window_bounds = array<i64: 64, 48>}, {pipeline_mode = #tpu.pipeline_mode<synchronous>, transform_indices = @transform_1, window_bounds = array<i64: 48, 16>}, {pipeline_mode = #tpu.pipeline_mode<synchronous>, transform_indices = @transform_2, window_bounds = array<i64: 1, 16>}, {transform_indices = @transform_3, window_bounds = array<i64: 64, 16>}]} {
    %c0 = arith.constant 0 : index
    %c0_0 = arith.constant 0 : index
    %0 = vector.load %arg1[%c0, %c0_0] : memref<64x48xbf16, #tpu.memory_space<vmem>>, vector<64x48xbf16>
    %c0_1 = arith.constant 0 : index
    %c0_2 = arith.constant 0 : index
    %1 = vector.load %arg2[%c0_1, %c0_2] : memref<48x16xbf16, #tpu.memory_space<vmem>>, vector<48x16xbf16>
    %cst = arith.constant dense<0.000000e+00> : vector<64x16xf32>
    %2 = tpu.matmul %0, %1, %cst {dimension_numbers = #tpu.dot_dimension_numbers<[1], [0], [0], [1], [0, 0, 1, 1], [], []>} : vector<64x48xbf16>, vector<48x16xbf16>, vector<64x16xf32> -> vector<64x16xf32>
    %c0_3 = arith.constant 0 : index
    %c0_4 = arith.constant 0 : index
    %3 = vector.load %arg3[%c0_3, %c0_4] : memref<1x16xf32, #tpu.memory_space<vmem>>, vector<1x16xf32>
    %4 = vector.broadcast %3 : vector<1x16xf32> to vector<64x16xf32>
    %5 = arith.addf %2, %4 : vector<64x16xf32>
    %cst_5 = arith.constant 0.000000e+00 : f32
    %6 = vector.broadcast %cst_5 : f32 to vector<64x16xf32>
    %7 = arith.maximumf %5, %6 : vector<64x16xf32>
    %8 = arith.truncf %7 : vector<64x16xf32> to vector<64x16xbf16>
    %c0_6 = arith.constant 0 : index
    %c0_7 = arith.constant 0 : index
    %9 = vector.load %arg4[%c0_6, %c0_7] : memref<64x16xbf16, #tpu.memory_space<vmem>>, vector<64x16xbf16>
    tpu.vector_store %arg4[%c0_6, %c0_7], %8 {strides = array<i32>} : memref<64x16xbf16, #tpu.memory_space<vmem>>, vector<64x16xbf16>,
    return
  }
  func.func @transform_0(%arg0: i32) -> (i32, i32) {
    %c0_i32 = arith.constant 0 : i32
    %c0_i32_0 = arith.constant 0 : i32
    return %arg0, %c0_i32 : i32, i32
  }
  func.func @transform_1(%arg0: i32) -> (i32, i32) {
    %c0_i32 = arith.constant 0 : i32
    %c0_i32_0 = arith.constant 0 : i32
    %c0_i32_1 = arith.constant 0 : i32
    return %c0_i32, %c0_i32_0 : i32, i32
  }
  func.func @transform_2(%arg0: i32) -> (i32, i32) {
    %c0_i32 = arith.constant 0 : i32
    %c0_i32_0 = arith.constant 0 : i32
    %c0_i32_1 = arith.constant 0 : i32
    return %c0_i32, %c0_i32_0 : i32, i32
  }
  func.func @transform_3(%arg0: i32) -> (i32, i32) {
    %c0_i32 = arith.constant 0 : i32
    %c0_i32_0 = arith.constant 0 : i32
    return %arg0, %c0_i32 : i32, i32
  }
}

module attributes {stable_mosaic.version = 11 : i64} {
  func.func @_matmul_bias_act_kernel(%arg0: i32, %arg1: memref<32x256xbf16, #tpu.memory_space<vmem>>, %arg2: memref<256x32xbf16, #tpu.memory_space<vmem>>, %arg3: memref<1x32xf32, #tpu.memory_space<vmem>>, %arg4: memref<32x32xbf16, #tpu.memory_space<vmem>>) attributes {dimension_semantics = [#tpu.dimension_semantics<parallel>], iteration_bounds = array<i64: 1>, scalar_prefetch = 0 : i64, scratch_operands = 0 : i64, tpu.core_type = #tpu.core_type<tc>, window_params = [{transform_indices = @transform_0, window_bounds = array<i64: 32, 256>}, {pipeline_mode = #tpu.pipeline_mode<synchronous>, transform_indices = @transform_1, window_bounds = array<i64: 256, 32>}, {pipeline_mode = #tpu.pipeline_mode<synchronous>, transform_indices = @transform_2, window_bounds = array<i64: 1, 32>}, {transform_indices = @transform_3, window_bounds = array<i64: 32, 32>}]} {
    %c0 = arith.constant 0 : index
    %c0_0 = arith.constant 0 : index
    %0 = vector.load %arg1[%c0, %c0_0] : memref<32x256xbf16, #tpu.memory_space<vmem>>, vector<32x256xbf16>
    %c0_1 = arith.constant 0 : index
    %c0_2 = arith.constant 0 : index
    %1 = vector.load %arg2[%c0_1, %c0_2] : memref<256x32xbf16, #tpu.memory_space<vmem>>, vector<256x32xbf16>
    %cst = arith.constant dense<0.000000e+00> : vector<32x32xf32>
    %2 = tpu.matmul %0, %1, %cst {dimension_numbers = #tpu.dot_dimension_numbers<[1], [0], [0], [1], [0, 0, 1, 1], [], []>} : vector<32x256xbf16>, vector<256x32xbf16>, vector<32x32xf32> -> vector<32x32xf32>
    %c0_3 = arith.constant 0 : index
    %c0_4 = arith.constant 0 : index
    %3 = vector.load %arg3[%c0_3, %c0_4] : memref<1x32xf32, #tpu.memory_space<vmem>>, vector<1x32xf32>
    %4 = vector.broadcast %3 : vector<1x32xf32> to vector<32x32xf32>
    %5 = arith.addf %2, %4 : vector<32x32xf32>
    %cst_5 = arith.constant 0.000000e+00 : f32
    %6 = vector.broadcast %cst_5 : f32 to vector<32x32xf32>
    %7 = arith.maximumf %5, %6 : vector<32x32xf32>
    %8 = arith.truncf %7 : vector<32x32xf32> to vector<32x32xbf16>
    %c0_6 = arith.constant 0 : index
    %c0_7 = arith.constant 0 : index
    %9 = vector.load %arg4[%c0_6, %c0_7] : memref<32x32xbf16, #tpu.memory_space<vmem>>, vector<32x32xbf16>
    tpu.vector_store %arg4[%c0_6, %c0_7], %8 {strides = array<i32>} : memref<32x32xbf16, #tpu.memory_space<vmem>>, vector<32x32xbf16>,
    return
  }
  func.func @transform_0(%arg0: i32) -> (i32, i32) {
    %c0_i32 = arith.constant 0 : i32
    %c0_i32_0 = arith.constant 0 : i32
    return %arg0, %c0_i32 : i32, i32
  }
  func.func @transform_1(%arg0: i32) -> (i32, i32) {
    %c0_i32 = arith.constant 0 : i32
    %c0_i32_0 = arith.constant 0 : i32
    %c0_i32_1 = arith.constant 0 : i32
    return %c0_i32, %c0_i32_0 : i32, i32
  }
  func.func @transform_2(%arg0: i32) -> (i32, i32) {
    %c0_i32 = arith.constant 0 : i32
    %c0_i32_0 = arith.constant 0 : i32
    %c0_i32_1 = arith.constant 0 : i32
    return %c0_i32, %c0_i32_0 : i32, i32
  }
  func.func @transform_3(%arg0: i32) -> (i32, i32) {
    %c0_i32 = arith.constant 0 : i32
    %c0_i32_0 = arith.constant 0 : i32
    return %arg0, %c0_i32 : i32, i32
  }
}

module attributes {stable_mosaic.version = 11 : i64} {
  func.func @_matmul_bias_act_kernel(%arg0: i32, %arg1: memref<8x512xbf16, #tpu.memory_space<vmem>>, %arg2: memref<512x64xbf16, #tpu.memory_space<vmem>>, %arg3: memref<1x64xf32, #tpu.memory_space<vmem>>, %arg4: memref<8x64xbf16, #tpu.memory_space<vmem>>) attributes {dimension_semantics = [#tpu.dimension_semantics<parallel>], iteration_bounds = array<i64: 1>, scalar_prefetch = 0 : i64, scratch_operands = 0 : i64, tpu.core_type = #tpu.core_type<tc>, window_params = [{transform_indices = @transform_0, window_bounds = array<i64: 8, 512>}, {pipeline_mode = #tpu.pipeline_mode<synchronous>, transform_indices = @transform_1, window_bounds = array<i64: 512, 64>}, {pipeline_mode = #tpu.pipeline_mode<synchronous>, transform_indices = @transform_2, window_bounds = array<i64: 1, 64>}, {transform_indices = @transform_3, window_bounds = array<i64: 8, 64>}]} {
    %c0 = arith.constant 0 : index
    %c0_0 = arith.constant 0 : index
    %0 = vector.load %arg1[%c0, %c0_0] : memref<8x512xbf16, #tpu.memory_space<vmem>>, vector<8x512xbf16>
    %c0_1 = arith.constant 0 : index
    %c0_2 = arith.constant 0 : index
    %1 = vector.load %arg2[%c0_1, %c0_2] : memref<512x64xbf16, #tpu.memory_space<vmem>>, vector<512x64xbf16>
    %cst = arith.constant dense<0.000000e+00> : vector<8x64xf32>
    %2 = tpu.matmul %0, %1, %cst {dimension_numbers = #tpu.dot_dimension_numbers<[1], [0], [0], [1], [0, 0, 1, 1], [], []>} : vector<8x512xbf16>, vector<512x64xbf16>, vector<8x64xf32> -> vector<8x64xf32>
    %c0_3 = arith.constant 0 : index
    %c0_4 = arith.constant 0 : index
    %3 = vector.load %arg3[%c0_3, %c0_4] : memref<1x64xf32, #tpu.memory_space<vmem>>, vector<1x64xf32>
    %4 = vector.broadcast %3 : vector<1x64xf32> to vector<8x64xf32>
    %5 = arith.addf %2, %4 : vector<8x64xf32>
    %cst_5 = arith.constant 0.000000e+00 : f32
    %6 = vector.broadcast %cst_5 : f32 to vector<8x64xf32>
    %7 = arith.maximumf %5, %6 : vector<8x64xf32>
    %8 = arith.truncf %7 : vector<8x64xf32> to vector<8x64xbf16>
    %c0_6 = arith.constant 0 : index
    %c0_7 = arith.constant 0 : index
    %9 = vector.load %arg4[%c0_6, %c0_7] : memref<8x64xbf16, #tpu.memory_space<vmem>>, vector<8x64xbf16>
    tpu.vector_store %arg4[%c0_6, %c0_7], %8 {strides = array<i32>} : memref<8x64xbf16, #tpu.memory_space<vmem>>, vector<8x64xbf16>,
    return
  }
  func.func @transform_0(%arg0: i32) -> (i32, i32) {
    %c0_i32 = arith.constant 0 : i32
    %c0_i32_0 = arith.constant 0 : i32
    return %arg0, %c0_i32 : i32, i32
  }
  func.func @transform_1(%arg0: i32) -> (i32, i32) {
    %c0_i32 = arith.constant 0 : i32
    %c0_i32_0 = arith.constant 0 : i32
    %c0_i32_1 = arith.constant 0 : i32
    return %c0_i32, %c0_i32_0 : i32, i32
  }
  func.func @transform_2(%arg0: i32) -> (i32, i32) {
    %c0_i32 = arith.constant 0 : i32
    %c0_i32_0 = arith.constant 0 : i32
    %c0_i32_1 = arith.constant 0 : i32
    return %c0_i32, %c0_i32_0 : i32, i32
  }
  func.func @transform_3(%arg0: i32) -> (i32, i32) {
    %c0_i32 = arith.constant 0 : i32
    %c0_i32_0 = arith.constant 0 : i32
    return %arg0, %c0_i32 : i32, i32
  }
}

module attributes {stable_mosaic.version = 11 : i64} {
  func.func @_fc_stack_kernel(%arg0: i32, %arg1: memref<2x256xbf16, #tpu.memory_space<vmem>>, %arg2: memref<256x128xbf16, #tpu.memory_space<vmem>>, %arg3: memref<1x128xf32, #tpu.memory_space<vmem>>, %arg4: memref<128x64xbf16, #tpu.memory_space<vmem>>, %arg5: memref<1x64xf32, #tpu.memory_space<vmem>>, %arg6: memref<64x10xbf16, #tpu.memory_space<vmem>>, %arg7: memref<1x10xf32, #tpu.memory_space<vmem>>, %arg8: memref<2x10xf32, #tpu.memory_space<vmem>>) attributes {dimension_semantics = [#tpu.dimension_semantics<parallel>], iteration_bounds = array<i64: 1>, scalar_prefetch = 0 : i64, scratch_operands = 0 : i64, tpu.core_type = #tpu.core_type<tc>, window_params = [{transform_indices = @transform_0, window_bounds = array<i64: 2, 256>}, {pipeline_mode = #tpu.pipeline_mode<synchronous>, transform_indices = @transform_1, window_bounds = array<i64: 256, 128>}, {pipeline_mode = #tpu.pipeline_mode<synchronous>, transform_indices = @transform_2, window_bounds = array<i64: 1, 128>}, {pipeline_mode = #tpu.pipeline_mode<synchronous>, transform_indices = @transform_3, window_bounds = array<i64: 128, 64>}, {pipeline_mode = #tpu.pipeline_mode<synchronous>, transform_indices = @transform_4, window_bounds = array<i64: 1, 64>}, {pipeline_mode = #tpu.pipeline_mode<synchronous>, transform_indices = @transform_5, window_bounds = array<i64: 64, 10>}, {pipeline_mode = #tpu.pipeline_mode<synchronous>, transform_indices = @transform_6, window_bounds = array<i64: 1, 10>}, {transform_indices = @transform_7, window_bounds = array<i64: 2, 10>}]} {
    %c0 = arith.constant 0 : index
    %c0_0 = arith.constant 0 : index
    %0 = vector.load %arg1[%c0, %c0_0] : memref<2x256xbf16, #tpu.memory_space<vmem>>, vector<2x256xbf16>
    %c0_1 = arith.constant 0 : index
    %c0_2 = arith.constant 0 : index
    %1 = vector.load %arg2[%c0_1, %c0_2] : memref<256x128xbf16, #tpu.memory_space<vmem>>, vector<256x128xbf16>
    %cst = arith.constant dense<0.000000e+00> : vector<2x128xf32>
    %2 = tpu.matmul %0, %1, %cst {dimension_numbers = #tpu.dot_dimension_numbers<[1], [0], [0], [1], [0, 0, 1, 1], [], []>} : vector<2x256xbf16>, vector<256x128xbf16>, vector<2x128xf32> -> vector<2x128xf32>
    %c0_3 = arith.constant 0 : index
    %c0_4 = arith.constant 0 : index
    %3 = vector.load %arg3[%c0_3, %c0_4] : memref<1x128xf32, #tpu.memory_space<vmem>>, vector<1x128xf32>
    %4 = vector.broadcast %3 : vector<1x128xf32> to vector<2x128xf32>
    %5 = arith.addf %2, %4 : vector<2x128xf32>
    %cst_5 = arith.constant 0.000000e+00 : f32
    %6 = vector.broadcast %cst_5 : f32 to vector<2x128xf32>
    %7 = arith.maximumf %5, %6 : vector<2x128xf32>
    %8 = arith.truncf %7 : vector<2x128xf32> to vector<2x128xbf16>
    %c0_6 = arith.constant 0 : index
    %c0_7 = arith.constant 0 : index
    %9 = vector.load %arg4[%c0_6, %c0_7] : memref<128x64xbf16, #tpu.memory_space<vmem>>, vector<128x64xbf16>
    %cst_8 = arith.constant dense<0.000000e+00> : vector<2x64xf32>
    %10 = tpu.matmul %8, %9, %cst_8 {dimension_numbers = #tpu.dot_dimension_numbers<[1], [0], [0], [1], [0, 0, 1, 1], [], []>} : vector<2x128xbf16>, vector<128x64xbf16>, vector<2x64xf32> -> vector<2x64xf32>
    %c0_9 = arith.constant 0 : index
    %c0_10 = arith.constant 0 : index
    %11 = vector.load %arg5[%c0_9, %c0_10] : memref<1x64xf32, #tpu.memory_space<vmem>>, vector<1x64xf32>
    %12 = vector.broadcast %11 : vector<1x64xf32> to vector<2x64xf32>
    %13 = arith.addf %10, %12 : vector<2x64xf32>
    %14 = arith.truncf %13 : vector<2x64xf32> to vector<2x64xbf16>
    %c0_11 = arith.constant 0 : index
    %c0_12 = arith.constant 0 : index
    %15 = vector.load %arg6[%c0_11, %c0_12] : memref<64x10xbf16, #tpu.memory_space<vmem>>, vector<64x10xbf16>
    %cst_13 = arith.constant dense<0.000000e+00> : vector<2x10xf32>
    %16 = tpu.matmul %14, %15, %cst_13 {dimension_numbers = #tpu.dot_dimension_numbers<[1], [0], [0], [1], [0, 0, 1, 1], [], []>} : vector<2x64xbf16>, vector<64x10xbf16>, vector<2x10xf32> -> vector<2x10xf32>
    %c0_14 = arith.constant 0 : index
    %c0_15 = arith.constant 0 : index
    %17 = vector.load %arg7[%c0_14, %c0_15] : memref<1x10xf32, #tpu.memory_space<vmem>>, vector<1x10xf32>
    %18 = vector.broadcast %17 : vector<1x10xf32> to vector<2x10xf32>
    %19 = arith.addf %16, %18 : vector<2x10xf32>
    %c0_16 = arith.constant 0 : index
    %c0_17 = arith.constant 0 : index
    %20 = vector.load %arg8[%c0_16, %c0_17] : memref<2x10xf32, #tpu.memory_space<vmem>>, vector<2x10xf32>
    tpu.vector_store %arg8[%c0_16, %c0_17], %19 {strides = array<i32>} : memref<2x10xf32, #tpu.memory_space<vmem>>, vector<2x10xf32>,
    return
  }
  func.func @transform_0(%arg0: i32) -> (i32, i32) {
    %c0_i32 = arith.constant 0 : i32
    %c0_i32_0 = arith.constant 0 : i32
    return %arg0, %c0_i32 : i32, i32
  }
  func.func @transform_1(%arg0: i32) -> (i32, i32) {
    %c0_i32 = arith.constant 0 : i32
    %c0_i32_0 = arith.constant 0 : i32
    %c0_i32_1 = arith.constant 0 : i32
    return %c0_i32, %c0_i32_0 : i32, i32
  }
  func.func @transform_2(%arg0: i32) -> (i32, i32) {
    %c0_i32 = arith.constant 0 : i32
    %c0_i32_0 = arith.constant 0 : i32
    %c0_i32_1 = arith.constant 0 : i32
    return %c0_i32, %c0_i32_0 : i32, i32
  }
  func.func @transform_3(%arg0: i32) -> (i32, i32) {
    %c0_i32 = arith.constant 0 : i32
    %c0_i32_0 = arith.constant 0 : i32
    %c0_i32_1 = arith.constant 0 : i32
    return %c0_i32, %c0_i32_0 : i32, i32
  }
  func.func @transform_4(%arg0: i32) -> (i32, i32) {
    %c0_i32 = arith.constant 0 : i32
    %c0_i32_0 = arith.constant 0 : i32
    %c0_i32_1 = arith.constant 0 : i32
    return %c0_i32, %c0_i32_0 : i32, i32
  }
  func.func @transform_5(%arg0: i32) -> (i32, i32) {
    %c0_i32 = arith.constant 0 : i32
    %c0_i32_0 = arith.constant 0 : i32
    %c0_i32_1 = arith.constant 0 : i32
    return %c0_i32, %c0_i32_0 : i32, i32
  }
  func.func @transform_6(%arg0: i32) -> (i32, i32) {
    %c0_i32 = arith.constant 0 : i32
    %c0_i32_0 = arith.constant 0 : i32
    %c0_i32_1 = arith.constant 0 : i32
    return %c0_i32, %c0_i32_0 : i32, i32
  }
  func.func @transform_7(%arg0: i32) -> (i32, i32) {
    %c0_i32 = arith.constant 0 : i32
    %c0_i32_0 = arith.constant 0 : i32
    return %arg0, %c0_i32 : i32, i32
  }
}

</mosaic_0001>

<bundles_post_ra>
// kernel: baselineh_forward.4
= control target key start
LH: loop header
LB: loop body
LE: loop exit
PB: predicated region body
PF: predicated region fallthrough
CT: control target
= control target key end

     0   :  { %s526_s12 = smov 0   ;;  %s570_s0 = inlined_call_operand.vmem [shape: bf16[128,48], index: 0, kind: input, shape index: {}]   ;;  %s571_s1 = inlined_call_operand.vmem [shape: bf16[48,16], index: 1, kind: input, shape index: {}]   ;;  %s572_s2 = inlined_call_operand.vmem [shape: f32[1,16], index: 2, kind: input, shape index: {}]   ;;  %s573_s3 = inlined_call_operand.vmem [shape: bf16[128,16], index: 3, kind: output, shape index: {}]  }
   0x1 LB: > { %s417_s13 = sadd.s32 4294967295, %s504_s12   ;;  %p421_p0 = scmp.ge.s32.totalorder %s504_s12, 1  ;;  %s504_s12 = sphi %s526_s12, %s13_s12  }
   0x2   : > { %p138_p1 = scmp.lt.s32.totalorder %s504_s12, 3 }
   0x4   : > { %p139_p2 = pnand %p421_p0, %p138_p1 }
   0x5   : > { %v491_v0 = vld [vmem:[%s571_s1] sm:$0xff] (!%p139_p2)   ;;  %s422_s16 = sshll.u32 (!%p139_p2), %s417_s13, 3  ;;  %v492_v1 = vld [vmem:[%s571_s1 + $0x8] sm:$0xff] (!%p139_p2)   ;;  %v493_v2 = vld [vmem:[%s571_s1 + $0x10] sm:$0xff] (!%p139_p2)   ;;  %vm234_vm0 = vcmask (!%p139_p2), 392192   ;;  %vm352_vm1 = vcmask (!%p139_p2), 125952  }
   0x6   : > { %142 = sbr.rel (%p139_p2) target bundleno = 240 (0xf0), region = 32  ;;  %p163_p3 = scmp.lt.s32.totalorder (!%p139_p2), %s422_s16, 15  ;;  %463 = vmatprep.subr.bf16.mxu0 (!%p139_p2), %v491_v0  ;;  %477 = vmatprep.subr.bf16.mxu1 (!%p139_p2), %v491_v0  ;;  %v426_v7 = vld [vmem:[%s572_s2] ss:$0 sm:$0xff] (!%p139_p2) }
   0x7   : > { %464 = vmatpush3.bf16.msra.mxu0 (!%p139_p2), %v491_v0  ;;  %480 = vmatpush3.bf16.msra.mxu1 (!%p139_p2), %v491_v0 }
   0x8   : > { %465 = vmatprep.subr.bf16.mxu0 (!%p139_p2), %v492_v1  ;;  %478 = vmatprep.subr.bf16.mxu1 (!%p139_p2), %v492_v1 }
   0xb   : > { %466 = vmatpush3.bf16.msra.mxu0 (!%p139_p2), %v492_v1  ;;  %481 = vmatpush3.bf16.msra.mxu1 (!%p139_p2), %v492_v1 }
   0xc   : > { %467 = vmatprep.subr.bf16.mxu0 (!%p139_p2), %v493_v2  ;;  %479 = vmatprep.subr.bf16.mxu1 (!%p139_p2), %v493_v2 }
   0xd   : > { %s575_s16 = smov (!%p163_p3, %s422_s16), 15 }
   0xe   : > { %s423_s21 = sshll.u32 %s575_s16, 2 }
   0xf   : > { %s166_s24 = scalar_lea.vmem %s570_s0, %s423_s21  ;;  %468 = vmatpush3.bf16.msra.mxu0 %v493_v2  ;;  %482 = vmatpush3.bf16.msra.mxu1 %v493_v2  ;;  %s172_s29 = scalar_lea.vmem %s573_s3, %s423_s21 }
  0x10   : > { %v494_v3 = vld [vmem:[%s166_s24] sm:$0xff]   ;;  %v495_v4 = vld [vmem:[%s166_s24 + $0x10] sm:$0xff]   ;;  %v496_v5 = vld [vmem:[%s166_s24 + $0x8] sm:$0xff]  }
  0x11   : > { %469 = vmatprep.mubr.msk.bf16.mxu0 %vm234_vm0, %v494_v3  ;;  %473 = vmatprep.mubr.msk.bf16.mxu1 %vm234_vm0, %v495_v4  ;;  %v497_v6 = vld [vmem:[%s166_s24 + $0x18] sm:$0xff]  }
  0x12   : > { %470 = vmatmul.mubr.msk.bf16.vlgmr.msra.gmra.mrb[0].mxu0 %vm234_vm0, %v496_v5  ;;  %474 = vmatmul.mubr.msk.bf16.vlgmr.msra.gmra.mrb[0].mxu1 %vm234_vm0, %v497_v6 }
  0xe5   : > { %v471_v8 = vpop.f32.mrb[0].mxu0  ;;  %v475_v9 = vpop.f32.mrb[0].mxu1 }
  0xe6   : > { %v290_v10 = vadd.f32 %v471_v8, %v426_v7  ;;  %v306_v11 = vadd.f32 %v475_v9, %v426_v7  ;;  %v281_v12 = vpop.f32.mrb[1].mxu0  ;;  %v297_v13 = vpop.f32.mrb[1].mxu1 }
  0xe7   : > { %v282_v14 = vadd.f32 %v426_v7, %v281_v12  ;;  %v298_v15 = vadd.f32 %v426_v7, %v297_v13  ;;  %v472_v16 = vpop.f32.mrb[2].mxu0  ;;  %v476_v17 = vpop.f32.mrb[2].mxu1 }
  0xe8   : > { %v314_v18 = vmax.f32 %v290_v10, 0.0  ;;  %v318_v19 = vmax.f32 %v306_v11, 0.0  ;;  %v293_v20 = vadd.f32 %v472_v16, %v426_v7  ;;  %v309_v21 = vadd.f32 %v476_v17, %v426_v7  ;;  %v284_v22 = vpop.f32.mrb[3].mxu0  ;;  %v300_v23 = vpop.f32.mrb[3].mxu1 }
  0xe9   : > { %v312_v24 = vmax.f32 %v282_v14, 0.0  ;;  %v316_v25 = vmax.f32 %v298_v15, 0.0  ;;  %v285_v26 = vadd.f32 %v426_v7, %v284_v22  ;;  %v301_v27 = vadd.f32 %v426_v7, %v300_v23 }
  0xea   : > { %v450_v28 = vpack.c.bf16 %v314_v18, %v314_v18  ;;  %v454_v29 = vpack.c.bf16 %v318_v19, %v318_v19  ;;  %v315_v30 = vmax.f32 %v293_v20, 0.0  ;;  %v319_v31 = vmax.f32 %v309_v21, 0.0 }
  0xeb   : > { %v448_v32 = vpack.c.bf16 %v312_v24, %v312_v24  ;;  %v452_v33 = vpack.c.bf16 %v316_v25, %v316_v25  ;;  %v313_v34 = vmax.f32 %v285_v26, 0.0  ;;  %v317_v35 = vmax.f32 %v301_v27, 0.0 }
  0xec   : > { %355 = vst.msk [vmem:[%s172_s29 + $0x8] sm:$0xf] %vm352_vm1, %v450_v28  ;;  %359 = vst.msk [vmem:[%s172_s29 + $0x18] sm:$0xf] %vm352_vm1, %v454_v29  ;;  %v451_v36 = vpack.c.bf16 %v315_v30, %v315_v30  ;;  %v455_v37 = vpack.c.bf16 %v319_v31, %v319_v31 }
  0xed   : > { %353 = vst.msk [vmem:[%s172_s29] sm:$0xf] %vm352_vm1, %v448_v32  ;;  %357 = vst.msk [vmem:[%s172_s29 + $0x10] sm:$0xf] %vm352_vm1, %v452_v33  ;;  %v449_v38 = vpack.c.bf16 %v313_v34, %v313_v34  ;;  %v453_v39 = vpack.c.bf16 %v317_v35, %v317_v35 }
  0xee   : > { %356 = vst.msk [vmem:[%s172_s29 + $0xc] sm:$0xf] %vm352_vm1, %v451_v36  ;;  %360 = vst.msk [vmem:[%s172_s29 + $0x1c] sm:$0xf] %vm352_vm1, %v455_v37 }
  0xef   : > { %354 = vst.msk [vmem:[%s172_s29 + $0x4] sm:$0xf] %vm352_vm1, %v449_v38  ;;  %358 = vst.msk [vmem:[%s172_s29 + $0x14] sm:$0xf] %vm352_vm1, %v453_v39 }
  0xf0 PF: > { %s13_s12 = sadd.s32 1, %s504_s12  }
  0xf1   : > { %p10_p4 = scmp.ge.s32.totalorder %s13_s12, 4  }
  0xf3   :  { %12 = sbr.rel (!%p10_p4) target bundleno = 1 (0x1), region = 62 }

// kernel: baselineh_forward.5
= control target key start
LH: loop header
LB: loop body
LE: loop exit
PB: predicated region body
PF: predicated region fallthrough
CT: control target
= control target key end

     0   :  { %vm243_vm0 = vcmask 257024   ;;  %s442_s1 = inlined_call_operand.vmem [shape: bf16[256,32], index: 1, kind: input, shape index: {}]   ;;  %s443_s0 = inlined_call_operand.vmem [shape: bf16[32,256], index: 0, kind: input, shape index: {}]   ;;  %s444_s2 = inlined_call_operand.vmem [shape: f32[1,32], index: 2, kind: input, shape index: {}]   ;;  %s445_s3 = inlined_call_operand.vmem [shape: bf16[32,32], index: 3, kind: output, shape index: {}]  }
   0x1   :  { %v325_v0 = vld [vmem:[%s442_s1 + $0x40] sm:$0xff]   ;;  %v327_v2 = vld [vmem:[%s442_s1 + $0x48] sm:$0xff]   ;;  %v329_v4 = vld [vmem:[%s442_s1 + $0x50] sm:$0xff]  }
   0x2   :  { %v326_v1 = vld [vmem:[%s442_s1] sm:$0xff]   ;;  %281 = vmatprep.subr.bf16.mxu0 %v325_v0  ;;  %309 = vmatprep.subr.bf16.mxu1 %v325_v0  ;;  %v328_v3 = vld [vmem:[%s442_s1 + $0x8] sm:$0xff]   ;;  %v330_v5 = vld [vmem:[%s442_s1 + $0x10] sm:$0xff]  }
   0x3   :  { %282 = vmatpush3.bf16.msra.mxu0 %v326_v1  ;;  %317 = vmatpush3.bf16.msra.mxu1 %v326_v1  ;;  %v331_v6 = vld [vmem:[%s442_s1 + $0x58] sm:$0xff]   ;;  %v333_v8 = vld [vmem:[%s442_s1 + $0x60] sm:$0xff]   ;;  %v335_v10 = vld [vmem:[%s442_s1 + $0x68] sm:$0xff]  }
   0x4   :  { %283 = vmatprep.subr.bf16.mxu0 %v327_v2  ;;  %310 = vmatprep.subr.bf16.mxu1 %v327_v2  ;;  %v332_v7 = vld [vmem:[%s442_s1 + $0x18] sm:$0xff]   ;;  %v334_v9 = vld [vmem:[%s442_s1 + $0x20] sm:$0xff]   ;;  %v336_v13 = vld [vmem:[%s442_s1 + $0x28] sm:$0xff]  }
   0x5   :  { %v343_v11 = vld [vmem:[%s443_s0 + $0x4] ss:$8 sps:$4 sm:$0xff]   ;;  %v346_v12 = vld [vmem:[%s443_s0 + $0x14] ss:$8 sps:$4 sm:$0xff]   ;;  %v341_v18 = vld [vmem:[%s443_s0] ss:$8 sps:$4 sm:$0xff]  }
   0x6   :  { %v337_v14 = vld [vmem:[%s442_s1 + $0x70] sm:$0xff]   ;;  %206 = vmatprep.mubr.bf16.mxu0 %v343_v11  ;;  %214 = vmatprep.mubr.bf16.mxu1 %v346_v12  ;;  %v339_v16 = vld [vmem:[%s442_s1 + $0x78] sm:$0xff]   ;;  %v252_v22 = vld [vmem:[%s444_s2] ss:$0 sm:$0xff] }
   0x7   :  { %284 = vmatpush3.bf16.msra.mxu0 %v328_v3  ;;  %318 = vmatpush3.bf16.msra.mxu1 %v328_v3  ;;  %v338_v15 = vld [vmem:[%s442_s1 + $0x30] sm:$0xff]   ;;  %v340_v17 = vld [vmem:[%s442_s1 + $0x38] sm:$0xff]  }
   0x8   :  { %285 = vmatprep.subr.bf16.mxu0 %v329_v4  ;;  %311 = vmatprep.subr.bf16.mxu1 %v329_v4  ;;  %v344_v19 = vld [vmem:[%s443_s0 + $0x10] ss:$8 sps:$4 sm:$0xff]  }
   0xb   :  { %286 = vmatpush3.bf16.msra.mxu0 %v330_v5  ;;  %319 = vmatpush3.bf16.msra.mxu1 %v330_v5 }
   0xc   :  { %287 = vmatprep.subr.bf16.mxu0 %v331_v6  ;;  %312 = vmatprep.subr.bf16.mxu1 %v331_v6 }
   0xf   :  { %288 = vmatpush3.bf16.msra.mxu0 %v332_v7  ;;  %320 = vmatpush3.bf16.msra.mxu1 %v332_v7 }
  0x10   :  { %289 = vmatprep.subr.bf16.mxu0 %v333_v8  ;;  %313 = vmatprep.subr.bf16.mxu1 %v333_v8 }
  0x13   :  { %290 = vmatpush3.bf16.msra.mxu0 %v334_v9  ;;  %321 = vmatpush3.bf16.msra.mxu1 %v334_v9 }
  0x14   :  { %291 = vmatprep.subr.bf16.mxu0 %v335_v10  ;;  %314 = vmatprep.subr.bf16.mxu1 %v335_v10 }
  0x17   :  { %292 = vmatpush3.bf16.msra.mxu0 %v336_v13  ;;  %322 = vmatpush3.bf16.msra.mxu1 %v336_v13 }
  0x18   :  { %293 = vmatprep.subr.bf16.mxu0 %v337_v14  ;;  %315 = vmatprep.subr.bf16.mxu1 %v337_v14 }
  0x1b   :  { %294 = vmatpush3.bf16.msra.mxu0 %v338_v15  ;;  %323 = vmatpush3.bf16.msra.mxu1 %v338_v15 }
  0x1c   :  { %295 = vmatprep.subr.bf16.mxu0 %v339_v16  ;;  %316 = vmatprep.subr.bf16.mxu1 %v339_v16 }
  0x1f   :  { %296 = vmatpush3.bf16.msra.mxu0 %v340_v17  ;;  %324 = vmatpush3.bf16.msra.mxu1 %v340_v17 }
  0x22   :  { %207 = vmatmul.mubr.bf16.vlgmr.msra.gmra.mrb[0].mxu0 %v341_v18  ;;  %215 = vmatmul.mubr.bf16.vlgmr.msra.gmra.mrb[0].mxu1 %v344_v19 }
  0xf5   :  { %v297_v20 = vpop.f32.mrb[0].mxu0  ;;  %v303_v21 = vpop.f32.mrb[0].mxu1 }
  0xf6   :  { %v298_v23 = vpop.f32.mrb[1].mxu0  ;;  %v304_v24 = vpop.f32.mrb[1].mxu1 }
  0xf7   :  { %v299_v25 = vadd.f32 %v298_v23, %v297_v20  ;;  %v305_v26 = vadd.f32 %v304_v24, %v303_v21  ;;  %v300_v27 = vpop.f32.mrb[2].mxu0  ;;  %v306_v28 = vpop.f32.mrb[2].mxu1 }
  0xf8   :  { %v301_v29 = vpop.f32.mrb[3].mxu0  ;;  %v307_v30 = vpop.f32.mrb[3].mxu1 }
  0xf9   :  { %v209_v31 = vadd.f32 %v299_v25, %v252_v22  ;;  %v217_v32 = vadd.f32 %v305_v26, %v252_v22  ;;  %v302_v33 = vadd.f32 %v301_v29, %v300_v27  ;;  %v308_v34 = vadd.f32 %v307_v30, %v306_v28 }
  0xfb   :  { %v223_v35 = vmax.f32 %v209_v31, 0.0  ;;  %v225_v36 = vmax.f32 %v217_v32, 0.0  ;;  %v212_v37 = vadd.f32 %v302_v33, %v252_v22  ;;  %v220_v38 = vadd.f32 %v308_v34, %v252_v22 }
  0xfd   :  { %v277_v39 = vpack.c.bf16 %v223_v35, %v223_v35  ;;  %v279_v40 = vpack.c.bf16 %v225_v36, %v225_v36  ;;  %v224_v41 = vmax.f32 %v212_v37, 0.0  ;;  %v226_v42 = vmax.f32 %v220_v38, 0.0 }
  0xff   :  { %244 = vst.msk [vmem:[%s445_s3] sm:$0xf] %vm243_vm0, %v277_v39  ;;  %246 = vst.msk [vmem:[%s445_s3 + $0x8] sm:$0xf] %vm243_vm0, %v279_v40  ;;  %v278_v43 = vpack.c.bf16 %v224_v41, %v224_v41  ;;  %v280_v44 = vpack.c.bf16 %v226_v42, %v226_v42 }
 0x101   :  { %245 = vst.msk [vmem:[%s445_s3 + $0x4] sm:$0xf] %vm243_vm0, %v278_v43  ;;  %247 = vst.msk [vmem:[%s445_s3 + $0xc] sm:$0xf] %vm243_vm0, %v280_v44 }

// kernel: baselineh_forward.6
= control target key start
LH: loop header
LB: loop body
LE: loop exit
PB: predicated region body
PF: predicated region fallthrough
CT: control target
= control target key end

     0   :  { %vm376_vm0 = vcmask 519168   ;;  %s627_s1 = inlined_call_operand.vmem [shape: bf16[512,64], index: 1, kind: input, shape index: {}]   ;;  %s628_s0 = inlined_call_operand.vmem [shape: bf16[8,512], index: 0, kind: input, shape index: {}]   ;;  %s629_s2 = inlined_call_operand.vmem [shape: f32[1,64], index: 2, kind: input, shape index: {}]   ;;  %s630_s3 = inlined_call_operand.vmem [shape: bf16[8,64], index: 3, kind: output, shape index: {}]  }
   0x1   :  { %v463_v0 = vld [vmem:[%s627_s1 + $0x40] sm:$0xff]   ;;  %v467_v4 = vld [vmem:[%s627_s1 + $0x48] sm:$0xff]   ;;  %v471_v8 = vld [vmem:[%s627_s1 + $0x50] sm:$0xff]  }
   0x2   :  { %v464_v1 = vld [vmem:[%s627_s1 + $0xc0] sm:$0xff]   ;;  %419 = vmatprep.subr.bf16.mxu0 %v463_v0  ;;  %v468_v5 = vld [vmem:[%s627_s1 + $0xc8] sm:$0xff]   ;;  %v472_v9 = vld [vmem:[%s627_s1 + $0xd0] sm:$0xff]  }
   0x3   :  { %v465_v2 = vld [vmem:[%s627_s1] sm:$0xff]   ;;  %441 = vmatprep.subr.bf16.mxu1 %v464_v1  ;;  %v469_v6 = vld [vmem:[%s627_s1 + $0x8] sm:$0xff]   ;;  %v473_v10 = vld [vmem:[%s627_s1 + $0x10] sm:$0xff]  }
   0x4   :  { %v466_v3 = vld [vmem:[%s627_s1 + $0x80] sm:$0xff]   ;;  %420 = vmatpush3.bf16.msra.mxu0 %v465_v2  ;;  %v470_v7 = vld [vmem:[%s627_s1 + $0x88] sm:$0xff]   ;;  %v474_v11 = vld [vmem:[%s627_s1 + $0x90] sm:$0xff]  }
   0x5   :  { %442 = vmatpush3.bf16.msra.mxu1 %v466_v3  ;;  %421 = vmatprep.subr.bf16.mxu0 %v467_v4  ;;  %v475_v12 = vld [vmem:[%s627_s1 + $0x58] sm:$0xff]   ;;  %v479_v16 = vld [vmem:[%s627_s1 + $0x60] sm:$0xff]   ;;  %v483_v20 = vld [vmem:[%s627_s1 + $0x68] sm:$0xff]  }
   0x6   :  { %443 = vmatprep.subr.bf16.mxu1 %v468_v5  ;;  %v476_v13 = vld [vmem:[%s627_s1 + $0xd8] sm:$0xff]   ;;  %v480_v17 = vld [vmem:[%s627_s1 + $0xe0] sm:$0xff]   ;;  %v484_v21 = vld [vmem:[%s627_s1 + $0xe8] sm:$0xff]  }
   0x7   :  { %v477_v14 = vld [vmem:[%s627_s1 + $0x18] sm:$0xff]   ;;  %v481_v18 = vld [vmem:[%s627_s1 + $0x20] sm:$0xff]   ;;  %v485_v22 = vld [vmem:[%s627_s1 + $0x28] sm:$0xff]  }
   0x8   :  { %422 = vmatpush3.bf16.msra.mxu0 %v469_v6  ;;  %v478_v15 = vld [vmem:[%s627_s1 + $0x98] sm:$0xff]   ;;  %v482_v19 = vld [vmem:[%s627_s1 + $0xa0] sm:$0xff]   ;;  %v486_v23 = vld [vmem:[%s627_s1 + $0xa8] sm:$0xff]  }
   0x9   :  { %444 = vmatpush3.bf16.msra.mxu1 %v470_v7  ;;  %423 = vmatprep.subr.bf16.mxu0 %v471_v8  ;;  %v487_v24 = vld [vmem:[%s627_s1 + $0x70] sm:$0xff]   ;;  %v491_v28 = vld [vmem:[%s627_s1 + $0x78] sm:$0xff]   ;;  %v15_v32 = vld [vmem:[%s628_s0] sm:$0xff] }
   0xa   :  { %445 = vmatprep.subr.bf16.mxu1 %v472_v9  ;;  %v488_v25 = vld [vmem:[%s627_s1 + $0xf0] sm:$0xff]   ;;  %v492_v29 = vld [vmem:[%s627_s1 + $0xf8] sm:$0xff]   ;;  %v16_v33 = vld [vmem:[%s628_s0 + $0x8] sm:$0xff]  ;;  %v383_v34 = vcombine.low %v15_v32, %v15_v32  ;;  %v384_v35 = vcombine.high %v15_v32, %v15_v32 }
   0xb   :  { %v489_v26 = vld [vmem:[%s627_s1 + $0x30] sm:$0xff]   ;;  %v493_v30 = vld [vmem:[%s627_s1 + $0x38] sm:$0xff]   ;;  %v385_v36 = vcombine.low %v16_v33, %v16_v33  ;;  %v386_v37 = vcombine.high %v16_v33, %v16_v33  ;;  %v382_v40 = vld [vmem:[%s629_s2] ss:$0 sm:$0xff] }
   0xc   :  { %424 = vmatpush3.bf16.msra.mxu0 %v473_v10  ;;  %v490_v27 = vld [vmem:[%s627_s1 + $0xb0] sm:$0xff]   ;;  %v494_v31 = vld [vmem:[%s627_s1 + $0xb8] sm:$0xff]   ;;  %326 = vmatprep.mubr.bf16.mxu0 %v384_v35 }
   0xd   :  { %446 = vmatpush3.bf16.msra.mxu1 %v474_v11  ;;  %425 = vmatprep.subr.bf16.mxu0 %v475_v12 }
   0xe   :  { %447 = vmatprep.subr.bf16.mxu1 %v476_v13  ;;  %366 = vmatprep.mubr.bf16.mxu1 %v386_v37 }
  0x10   :  { %426 = vmatpush3.bf16.msra.mxu0 %v477_v14 }
  0x11   :  { %448 = vmatpush3.bf16.msra.mxu1 %v478_v15  ;;  %427 = vmatprep.subr.bf16.mxu0 %v479_v16 }
  0x12   :  { %449 = vmatprep.subr.bf16.mxu1 %v480_v17 }
  0x14   :  { %428 = vmatpush3.bf16.msra.mxu0 %v481_v18 }
  0x15   :  { %450 = vmatpush3.bf16.msra.mxu1 %v482_v19  ;;  %429 = vmatprep.subr.bf16.mxu0 %v483_v20 }
  0x16   :  { %451 = vmatprep.subr.bf16.mxu1 %v484_v21 }
  0x18   :  { %430 = vmatpush3.bf16.msra.mxu0 %v485_v22 }
  0x19   :  { %452 = vmatpush3.bf16.msra.mxu1 %v486_v23  ;;  %431 = vmatprep.subr.bf16.mxu0 %v487_v24 }
  0x1a   :  { %453 = vmatprep.subr.bf16.mxu1 %v488_v25 }
  0x1c   :  { %432 = vmatpush3.bf16.msra.mxu0 %v489_v26 }
  0x1d   :  { %454 = vmatpush3.bf16.msra.mxu1 %v490_v27  ;;  %433 = vmatprep.subr.bf16.mxu0 %v491_v28 }
  0x1e   :  { %455 = vmatprep.subr.bf16.mxu1 %v492_v29 }
  0x20   :  { %434 = vmatpush3.bf16.msra.mxu0 %v493_v30 }
  0x21   :  { %456 = vmatpush3.bf16.msra.mxu1 %v494_v31 }
  0x23   :  { %327 = vmatmul.mubr.bf16.vlgmr.msra.gmra.mrb[0].mxu0 %v383_v34 }
  0x24   :  { %367 = vmatmul.mubr.bf16.vlgmr.msra.gmra.mrb[0].mxu1 %v385_v36 }
  0xf6   :  { %v435_v38 = vpop.f32.mrb[0].mxu0 }
  0xf7   :  { %v457_v39 = vpop.f32.mrb[0].mxu1  ;;  %v436_v41 = vpop.f32.mrb[1].mxu0 }
  0xf8   :  { %v458_v42 = vpop.f32.mrb[1].mxu1  ;;  %v437_v43 = vadd.f32 %v436_v41, %v435_v38  ;;  %v438_v45 = vpop.f32.mrb[2].mxu0 }
  0xf9   :  { %v459_v44 = vadd.f32 %v458_v42, %v457_v39  ;;  %v460_v46 = vpop.f32.mrb[2].mxu1  ;;  %v439_v47 = vpop.f32.mrb[3].mxu0 }
  0xfa   :  { %v461_v48 = vpop.f32.mrb[3].mxu1  ;;  %v329_v49 = vadd.f32 %v437_v43, %v382_v40 }
  0xfc   :  { %v369_v50 = vadd.f32 %v459_v44, %v329_v49 }
  0xfe   :  { %v374_v51 = vmax.f32 %v369_v50, 0.0 }
 0x100   :  { %v375_v52 = vpack.c.bf16 %v374_v51, %v374_v51 }
 0x102   :  { %377 = vst.msk [vmem:[%s630_s3] sm:$0xf] %vm376_vm0, %v375_v52 }

// kernel: baselineh_forward.7
= control target key start
LH: loop header
LB: loop body
LE: loop exit
PB: predicated region body
PF: predicated region fallthrough
CT: control target
= control target key end

     0   :  { %v599_v2 = vmov 0.0   ;;  %v80_v10 = vlaneseq  ;;  %v600_v14 = vmov 1966171168   ;;  %s765_s0 = inlined_call_operand.vmem [shape: bf16[2,256], index: 0, kind: input, shape index: {}]   ;;  %s766_s1 = inlined_call_operand.vmem [shape: bf16[256,128], index: 1, kind: input, shape index: {}]   ;;  %s767_s2 = inlined_call_operand.vmem [shape: f32[1,128], index: 2, kind: input, shape index: {}]   ;;  %s768_s3 = inlined_call_operand.vmem [shape: bf16[128,64], index: 3, kind: input, shape index: {}]   ;;  %s769_s4 = inlined_call_operand.vmem [shape: f32[1,64], index: 4, kind: input, shape index: {}]   ;;  %s770_s5 = inlined_call_operand.vmem [shape: bf16[64,10], index: 5, kind: input, shape index: {}]   ;;  %s771_s6 = inlined_call_operand.vmem [shape: f32[1,10], index: 6, kind: input, shape index: {}]   ;;  %s772_s7 = inlined_call_operand.hbm [shape: f32[2,10], index: 7, kind: output, shape index: {}]  }
   0x1   :  { %v547_v0 = vld [vmem:[%s766_s1 + $0x40] sm:$0xff]   ;;  %511 = vmatprep.subr.bf16.mxu1 %v599_v2  ;;  %v549_v3 = vld [vmem:[%s766_s1 + $0x48] sm:$0xff]   ;;  %v551_v5 = vld [vmem:[%s766_s1 + $0x50] sm:$0xff]   ;;  %v78_v15 = vunpack.c.l.s4 %v600_v14 }
   0x2   :  { %v548_v1 = vld [vmem:[%s766_s1] sm:$0xff]   ;;  %475 = vmatprep.subr.bf16.mxu0 %v547_v0  ;;  %v550_v4 = vld [vmem:[%s766_s1 + $0x8] sm:$0xff]   ;;  %v552_v6 = vld [vmem:[%s766_s1 + $0x10] sm:$0xff]   ;;  %v81_v16 = vshrl.u32 %v80_v10, 7 }
   0x3   :  { %476 = vmatpush3.bf16.msra.mxu0 %v548_v1  ;;  %v553_v7 = vld [vmem:[%s766_s1 + $0x58] sm:$0xff]   ;;  %v555_v9 = vld [vmem:[%s766_s1 + $0x60] sm:$0xff]   ;;  %v557_v12 = vld [vmem:[%s766_s1 + $0x68] sm:$0xff]   ;;  %v79_v20 = vunpack.c.0.s8 %v78_v15 }
   0x4   :  { %477 = vmatprep.subr.bf16.mxu0 %v549_v3  ;;  %v554_v8 = vld [vmem:[%s766_s1 + $0x18] sm:$0xff]   ;;  %v556_v11 = vld [vmem:[%s766_s1 + $0x20] sm:$0xff]   ;;  %v558_v18 = vld [vmem:[%s766_s1 + $0x28] sm:$0xff]  }
   0x5   :  { %v443_v13 = vld.sshfl [vmem:[%s765_s0] sm:$0x11 pattern:$0x75316420]  ;;  %v564_v21 = vld [vmem:[%s768_s3 + $0x8] sm:$0xff]   ;;  %v559_v22 = vld [vmem:[%s766_s1 + $0x70] sm:$0xff]   ;;  %v82_v24 = vsub.s32 %v79_v20, %v81_v16 }
   0x6   :  { %v563_v17 = vld [vmem:[%s768_s3] sm:$0xff]   ;;  %v76_v19 = vcombine.high %v443_v13, %v443_v13  ;;  %v560_v23 = vld [vmem:[%s766_s1 + $0x30] sm:$0xff]   ;;  %v561_v25 = vld [vmem:[%s766_s1 + $0x78] sm:$0xff]  }
   0x7   :  { %478 = vmatpush3.bf16.msra.mxu0 %v550_v4  ;;  %512 = vmatpush3.bf16.msra.mxu1 %v563_v17  ;;  %v565_v26 = vld [vmem:[%s768_s3 + $0x10] sm:$0xff]   ;;  %v562_v28 = vld [vmem:[%s766_s1 + $0x38] sm:$0xff]  }
   0x8   :  { %479 = vmatprep.subr.bf16.mxu0 %v551_v5  ;;  %513 = vmatprep.subr.bf16.mxu1 %v599_v2  ;;  %v90_v27 = vrot.slane %v76_v19, %v82_v24  ;;  %v566_v29 = vld [vmem:[%s768_s3 + $0x18] sm:$0xff]  }
   0xa   :  { %221 = vmatprep.mubr.bf16.mxu0 %v90_v27 }
   0xb   :  { %480 = vmatpush3.bf16.msra.mxu0 %v552_v6  ;;  %514 = vmatpush3.bf16.msra.mxu1 %v564_v21 }
   0xc   :  { %481 = vmatprep.subr.bf16.mxu0 %v553_v7  ;;  %515 = vmatprep.subr.bf16.mxu1 %v599_v2 }
   0xf   :  { %482 = vmatpush3.bf16.msra.mxu0 %v554_v8  ;;  %516 = vmatpush3.bf16.msra.mxu1 %v565_v26 }
  0x10   :  { %483 = vmatprep.subr.bf16.mxu0 %v555_v9 }
  0x13   :  { %484 = vmatpush3.bf16.msra.mxu0 %v556_v11 }
  0x14   :  { %485 = vmatprep.subr.bf16.mxu0 %v557_v12 }
  0x17   :  { %486 = vmatpush3.bf16.msra.mxu0 %v558_v18 }
  0x18   :  { %487 = vmatprep.subr.bf16.mxu0 %v559_v22 }
  0x1b   :  { %488 = vmatpush3.bf16.msra.mxu0 %v560_v23 }
  0x1c   :  { %12 = vsyncpa [#allocation3], 0  ;;  %489 = vmatprep.subr.bf16.mxu0 %v561_v25  ;;  %517 = vmatprep.subr.bf16.mxu1 %v599_v2  ;;  %v83_v30 = vrot.slane %v443_v13, %v82_v24  ;;  %v567_v31 = vld [vmem:[%s768_s3 + $0x20] sm:$0xff]   ;;  %v568_v32 = vld [vmem:[%s768_s3 + $0x28] sm:$0xff]   ;;  %vm601_vm0 = vmmov 0   ;;  %vm382_vm1 = vcmask 523264  }
  0x1d   :  { %518 = vmatpush3.bf16.msra.mxu1 %v566_v29  ;;  %v569_v33 = vld [vmem:[%s768_s3 + $0x30] sm:$0xff]   ;;  %v570_v34 = vld [vmem:[%s768_s3 + $0x38] sm:$0xff]   ;;  %527 = vmatprep.mubr.msk.bf16.mxu1 %vm601_vm0, %v599_v2  ;;  %v571_v35 = vld [vmem:[%s770_s5] sm:$0xff]   ;;  %s602_s14 = smov [#allocation2]   ;;  %vm426_vm2 = vcmask 74752  }
  0x1e   :  { %519 = vmatprep.subr.bf16.mxu1 %v599_v2  ;;  %v572_v36 = vld [vmem:[%s770_s5 + $0x8] sm:$0xff]   ;;  %v573_v37 = vld [vmem:[%s770_s5 + $0x10] sm:$0xff]   ;;  %v442_v39 = vld [vmem:[%s767_s2] ss:$0 sm:$0xff]  ;;  %s434_s15 = sshll.u32 %s602_s14, 4  ;;  %s435_s15 = int_to_ptr.vmem [resolvable:$true] %s434_s15 }
  0x1f   :  { %490 = vmatpush3.bf16.msra.mxu0 %v562_v28  ;;  %v574_v47 = vld [vmem:[%s770_s5 + $0x18] sm:$0xff]   ;;  %v460_v48 = vld [vmem:[%s769_s4] ss:$0 sm:$0xff]  ;;  %s575_s4 = scalar_lea.vmem %s435_s15, 32  ;;  %p580_p1 = scmp.lt.s32.totalorder %s435_s15, %s435_s15 }
  0x20   :  { %531 = vmatprep.subr.bf16.mxu0 %v599_v2  ;;  %v469_v55 = vld [vmem:[%s771_s6] ss:$0 sm:$0xff]  ;;  %p576_p0 = scmp.ne.s32.totalorder %s435_s15, %s575_s4  ;;  %p581_p2 = scmp.lt.s32.totalorder %s575_s4, %s575_s4 }
  0x21   :  { %520 = vmatpush3.bf16.msra.mxu1 %v567_v31 }
  0x22   :  { %222 = vmatmul.mubr.bf16.vlgmr.msra.gmra.mrb[0].mxu0 %v83_v30  ;;  %521 = vmatprep.subr.bf16.mxu1 %v599_v2  ;;  %p582_p3 = por %p581_p2, %p580_p1 }
  0x23   :  { %539 = vmatprep.mubr.msk.bf16.mxu0 %vm601_vm0, %v599_v2  ;;  %532 = vmatpush3.bf16.msra.mxu0 %v571_v35 }
  0x24   :  { %533 = vmatprep.subr.bf16.mxu0 %v599_v2  ;;  %p583_p4 = pnand %p582_p3, %p576_p0 }
  0x25   :  { %522 = vmatpush3.bf16.msra.mxu1 %v568_v32 }
  0x26   :  { %523 = vmatprep.subr.bf16.mxu1 %v599_v2 }
  0x27   :  { %534 = vmatpush3.bf16.msra.mxu0 %v572_v36 }
  0x28   :  { %535 = vmatprep.subr.bf16.mxu0 %v599_v2 }
  0x29   :  { %524 = vmatpush3.bf16.msra.mxu1 %v569_v33 }
  0x2a   :  { %525 = vmatprep.subr.bf16.mxu1 %v599_v2 }
  0x2b   :  { %536 = vmatpush3.bf16.msra.mxu0 %v573_v37 }
  0x2c   :  { %537 = vmatprep.subr.bf16.mxu0 %v599_v2 }
  0x2d   :  { %526 = vmatpush3.bf16.msra.mxu1 %v570_v34 }
  0x2f   :  { %538 = vmatpush3.bf16.msra.mxu0 %v574_v47 }
  0xf5   :  { %v491_v38 = vpop.f32.mrb[0].mxu0 }
  0xf6   :  { %v492_v40 = vpop.f32.mrb[1].mxu0 }
  0xf7   :  { %v493_v41 = vadd.f32 %v492_v40, %v491_v38  ;;  %v494_v42 = vpop.f32.mrb[2].mxu0 }
  0xf8   :  { %v495_v43 = vpop.f32.mrb[3].mxu0 }
  0xf9   :  { %v224_v44 = vadd.f32 %v493_v41, %v442_v39 }
  0xfb   :  { %v229_v45 = vmax.f32 %v224_v44, 0.0 }
  0xfd   :  { %v230_v46 = vpack.c.bf16 %v229_v45, %v229_v45 }
  0xff   :  { %528 = vmatmul.mubr.bf16.vlgmr.msra.gmra.mrb[0].mxu1 %v230_v46 }
 0x1d2   :  { %v336_v49 = vpop.f32.mrb[0].mxu1 }
 0x1d3   :  { %v337_v50 = vadd.f32 %v460_v48, %v336_v49  ;;  %v529_v51 = vpop.f32.mrb[1].mxu1 }
 0x1d4   :  { %v339_v52 = vpop.f32.mrb[2].mxu1 }
 0x1d5   :  { %v342_v53 = vpack.c.bf16 %v337_v50, %v337_v50  ;;  %v530_v54 = vpop.f32.mrb[3].mxu1 }
 0x1d7   :  { %540 = vmatmul.mubr.msk.bf16.vlgmr.msra.gmra.mrb[4].mxu0 %vm382_vm1, %v342_v53 }
 0x2aa   :  { %v420_v56 = vpop.f32.mrb[4].mxu0 }
 0x2ab   :  { %v421_v57 = vadd.f32 %v469_v55, %v420_v56  ;;  %v541_v58 = vpop.f32.mrb[5].mxu0 }
 0x2ac   :  { %v423_v59 = vpop.f32.mrb[6].mxu0 }
 0x2ad   :  { %v542_v60 = vpop.f32.mrb[7].mxu0  ;;  %427 = vst.msk [vmem:[#allocation2] sm:$0x3] %vm426_vm2, %v421_v57 }
 0x2ae   :  { %586 = shalt.err (!%p583_p4)
}
 0x2af   :  { %s587_s6 = scalar_lea.hbm %s772_s7, 32 }
 0x2b0   :  { %p588_p5 = scmp.ne.s32.totalorder %s772_s7, %s587_s6  ;;  %p591_p6 = scmp.lt.u32.totalorder %s587_s6, %s772_s7 }
 0x2b2   :  { %p593_p7 = pnand %p591_p6, %p588_p5 }
 0x2b4   :  { %596 = shalt.err (!%p593_p7)
}
 0x2b5   :  { %437 = dma.vmem_to_hbm [thread:$0]  %s435_s15, 32, %s772_s7, [#allocation3]  }
 0x2b6   :  { %597 = dma.done.wait [#allocation3], 32  }
 0x2b7   :  { %598 = vsyncadd [#allocation3], 4294967264 }
 0x2b8   :  { %441 = vsyncpa [#allocation3], 1 }

</bundles_post_ra>
